<compile_context>
chip_gen: v5e
topology: v5e:2x2
jax: 0.10.0
libtpu: 0.0.40
codegen_flags: <defaults>
</compile_context>

<pallas_src>
import functools

import jax
import jax.numpy as jnp
from jax.experimental import pallas as pl
from jax.experimental.pallas import tpu as pltpu


def _round_up(x, m):
    return (x + m - 1) // m * m


# ---------------------------------------------------------------------------
# Fused two-tower MLP kernel
# ---------------------------------------------------------------------------
def _fused_mlp_kernel(num_layers, x_ref, *refs):
    """One (tower, batch-tile) grid step: h = relu(h @ W_l + b_l) per layer."""
    o_ref = refs[-1]
    h = x_ref[...]
    for l in range(num_layers):
        w_ref = refs[2 * l]
        b_ref = refs[2 * l + 1]
        acc = jnp.dot(h.astype(w_ref.dtype), w_ref[...],
                      preferred_element_type=jnp.float32)
        # torchrec Perceptron: ReLU after every layer; bias add + ReLU in f32.
        h = jnp.maximum(acc + b_ref[...].astype(jnp.float32), 0.0)
    o_ref[...] = h.astype(o_ref.dtype)


def _vmem_budget_bytes():
    """Per-generation scoped-VMEM budget, leaving headroom for compiler scratch."""
    try:
        cap = int(pltpu.get_tpu_info().vmem_capacity_bytes)
    except Exception:
        # Info query only (never hides kernel errors); conservative default.
        cap = 64 << 20
    if cap <= (64 << 20):                       # v7x: 64 MiB per TensorCore
        return 48 << 20
    return min(96 << 20, cap - (32 << 20))      # v5e / v6e: 128 MiB parts


def _pick_tm(n, fits_vmem):
    """Batch tile: sublane-aligned, VMEM-feasible, balancing tail padding
    against per-grid-step overhead (~0.35 us/step ~= a few hundred rows of
    this thin-layer work)."""
    n_aligned = _round_up(max(n, 1), 8)
    cands = [t for t in (1024, 512, 256, 128, 64, 32, 16, 8)
             if t <= n_aligned and fits_vmem(t)]
    if not cands:
        cands = [8]

    def cost(t):
        n_pad = _round_up(n_aligned, t)
        return n_pad + 384 * (n_pad // t)       # padded rows + overhead-equivalent rows/step

    return min(cands, key=lambda t: (cost(t), -t))


def prepare_fused_tower_params(query_layers, candidate_layers):
    """Pad (once, at init) and stack the per-layer weights/biases of both towers.

    Layer 0 keeps its raw input dim (full-dim blocks are exempt from the 128
    rule, so pooled activations are never zero-padded through HBM); all output
    dims are padded to multiples of 128 (lane-dense, unmasked stores).
    Zero padding is numerically exact for Linear+ReLU: padded output columns
    carry zero weights and zero bias, so they stay exactly 0 through the ReLU
    and contribute nothing to the next layer.  (Do NOT pad the bias with
    nonzero values or switch to a non-zero-preserving activation.)
    """
    assert len(query_layers) == len(candidate_layers) and len(query_layers) > 0
    d_in = query_layers[0][0].shape[0]
    assert candidate_layers[0][0].shape[0] == d_in
    dims = [d_in] + [w.shape[1] for w, _ in query_layers]
    pdims = [d_in] + [_round_up(d, 128) for d in dims[1:]]

    layers = []
    for l, ((wq, bq), (wc, bc)) in enumerate(zip(query_layers, candidate_layers)):
        di, do = wq.shape
        assert wc.shape == (di, do), "both towers must share layer sizes"
        din_p, dout_p = pdims[l], pdims[l + 1]
        w2 = jnp.zeros((2, din_p, dout_p), wq.dtype)
        w2 = w2.at[0, :di, :do].set(wq).at[1, :di, :do].set(wc)
        b2 = jnp.zeros((2, 1, dout_p), bq.dtype)
        b2 = b2.at[0, 0, :do].set(bq.reshape(-1)).at[1, 0, :do].set(bc.reshape(-1))
        layers.append((w2, b2))
    return {"layers": layers, "dims": dims, "pdims": pdims}


def fused_two_tower_mlp(q_pooled, c_pooled, fused):
    """Runs both MLP towers in a single pallas_call; grid = (tower, batch tile)."""
    layers, dims, pdims = fused["layers"], fused["dims"], fused["pdims"]
    num_layers = len(layers)
    n, d_in = q_pooled.shape
    assert c_pooled.shape == (n, d_in) and d_in == dims[0]
    d_out = dims[-1]
    dtype = q_pooled.dtype
    itemsize = jnp.dtype(dtype).itemsize

    # Per-tower (single-block) weight/bias bytes; pipeline double-buffers them.
    w_block_bytes = 0
    for w2, b2 in layers:
        w_block_bytes += w2.shape[1] * w2.shape[2] * jnp.dtype(w2.dtype).itemsize
        w_block_bytes += b2.shape[1] * b2.shape[2] * jnp.dtype(b2.dtype).itemsize

    budget = _vmem_budget_bytes()

    def vmem_need(tm):
        x_tile = tm * d_in * itemsize
        o_tile = tm * pdims[-1] * itemsize
        inter = 2 * tm * max(pdims) * 4             # two live f32 intermediates
        return 2 * (x_tile + o_tile) + 2 * w_block_bytes + inter + (2 << 20)

    tm = _pick_tm(n, lambda t: vmem_need(t) <= budget)
    n_pad = _round_up(max(n, 1), tm)

    # Stack both towers' pooled activations; pad only the batch axis to a tile
    # multiple.  The feature dim stays unpadded -> no inflated HBM round trip.
    x = jnp.stack([q_pooled, c_pooled], axis=0)                 # (2, N, d_in)
    if n_pad != n:
        x = jnp.pad(x, ((0, 0), (0, n_pad - n), (0, 0)))

    operands = [x]
    in_specs = [pl.BlockSpec((pl.Squeezed(), tm, d_in), lambda t, i: (t, i, 0))]
    for w2, b2 in layers:
        operands += [w2, b2]
        in_specs += [
            pl.BlockSpec((pl.Squeezed(),) + tuple(w2.shape[1:]),
                         lambda t, i: (t, 0, 0)),
            pl.BlockSpec((pl.Squeezed(),) + tuple(b2.shape[1:]),
                         lambda t, i: (t, 0, 0)),
        ]

    vmem_limit = int(min(budget, max(vmem_need(tm) + (2 << 20), 16 << 20)))
    flops = 2 * 2 * n_pad * sum(pdims[l] * pdims[l + 1] for l in range(num_layers))
    bytes_accessed = 2 * n_pad * (d_in + pdims[-1]) * itemsize + 2 * w_block_bytes

    out = pl.pallas_call(
        functools.partial(_fused_mlp_kernel, num_layers),
        out_shape=jax.ShapeDtypeStruct((2, n_pad, pdims[-1]), dtype),
        grid_spec=pltpu.PrefetchScalarGridSpec(
            num_scalar_prefetch=0,
            # Tower axis leading: within a tower the weight block index is
            # constant -> weights stay VMEM-resident, re-fetched only once.
            grid=(2, n_pad // tm),
            in_specs=in_specs,
            out_specs=pl.BlockSpec((pl.Squeezed(), tm, pdims[-1]),
                                   lambda t, i: (t, i, 0)),
        ),
        compiler_params=pltpu.CompilerParams(
            # Both axes are independent; on v7x the two TensorCores split the
            # grid (one tower each for small batches).
            dimension_semantics=("parallel", "parallel"),
            vmem_limit_bytes=vmem_limit,
        ),
        cost_estimate=pl.CostEstimate(flops=int(flops), transcendentals=0,
                                      bytes_accessed=int(bytes_accessed)),
    )(*operands)

    out = out[:, :n, :d_out]
    return out[0], out[1]


# ---------------------------------------------------------------------------
# Parameter init + TwoTower forward
# ---------------------------------------------------------------------------
def init_two_tower_params(key, num_embeddings, embedding_dim, layer_sizes,
                          dtype=jnp.float32):
    """Two embedding tables + two MLP towers. Linear weights stored as (in, out)."""
    keys = jax.random.split(key, 2 + 4 * len(layer_sizes))
    params = {
        "query_table": jax.random.normal(
            keys[0], (num_embeddings, embedding_dim), dtype) * 0.1,
        "candidate_table": jax.random.normal(
            keys[1], (num_embeddings, embedding_dim), dtype) * 0.1,
    }

    def make_mlp(ks, in_size):
        layers = []
        prev = in_size
        for i, out_size in enumerate(layer_sizes):
            bound = 1.0 / (prev ** 0.5)   # nn.Linear default U(-1/sqrt(fan_in), +)
            w = jax.random.uniform(ks[2 * i], (prev, out_size), dtype, -bound, bound)
            b = jax.random.uniform(ks[2 * i + 1], (out_size,), dtype, -bound, bound)
            layers.append((w, b))
            prev = out_size
        return layers

    n = 2 * len(layer_sizes)
    params["query_proj"] = make_mlp(keys[2:2 + n], embedding_dim)
    params["candidate_proj"] = make_mlp(keys[2 + n:2 + 2 * n], embedding_dim)
    # Pad + stack ONCE here (not per forward step).
    params["fused_proj"] = prepare_fused_tower_params(
        params["query_proj"], params["candidate_proj"])
    return params


def two_tower_forward(params, query_ids, candidate_ids):
    """TwoTower.forward: EBC SUM pooling, then both MLP towers in one Pallas call."""
    # EmbeddingBagCollection (SUM pooling) over fixed-size id bags, in plain JAX.
    # TODO(synk): jagged KJT offsets / per-sample bag lengths and fusing the
    #             gather+pool into the kernel are not implemented.
    q_pooled = jnp.take(params["query_table"], query_ids, axis=0).sum(axis=1)
    c_pooled = jnp.take(params["candidate_table"], candidate_ids, axis=0).sum(axis=1)
    return fused_two_tower_mlp(q_pooled, c_pooled, params["fused_proj"])


if __name__ == "__main__":
    key = jax.random.PRNGKey(0)
    k_p, k_q, k_c = jax.random.split(key, 3)

    batch = 4
    num_embeddings = 100
    embedding_dim = 32
    layer_sizes = [16, 8]
    bag_q, bag_c = 3, 5

    params = init_two_tower_params(k_p, num_embeddings, embedding_dim, layer_sizes)
    query_ids = jax.random.randint(k_q, (batch, bag_q), 0, num_embeddings)
    candidate_ids = jax.random.randint(k_c, (batch, bag_c), 0, num_embeddings)

    q_emb, c_emb = two_tower_forward(params, query_ids, candidate_ids)
    q_emb, c_emb = jax.block_until_ready((q_emb, c_emb))

    # Pure-JAX reference (same semantics: EBC sum pooling + Perceptron stack).
    def mlp_ref(x, layers):
        h = x
        for w, b in layers:
            h = jnp.maximum(h @ w + b, 0.0)
        return h

    q_pooled = jnp.take(params["query_table"], query_ids, axis=0).sum(axis=1)
    c_pooled = jnp.take(params["candidate_table"], candidate_ids, axis=0).sum(axis=1)
    q_ref = mlp_ref(q_pooled, params["query_proj"])
    c_ref = mlp_ref(c_pooled, params["candidate_proj"])

    assert q_emb.shape == (batch, layer_sizes[-1])
    assert c_emb.shape == (batch, layer_sizes[-1])
    assert jnp.allclose(q_emb, q_ref, atol=1e-4, rtol=1e-4)
    assert jnp.allclose(c_emb, c_ref, atol=1e-4, rtol=1e-4)

    print("KERNEL_OK")
</pallas_src>

<mosaic_0001>
module attributes {stable_mosaic.version = 11 : i64} {
  func.func @_fused_mlp_kernel(%arg0: i32, %arg1: i32, %arg2: memref<1x8x32xf32, #tpu.memory_space<vmem>>, %arg3: memref<1x32x128xf32, #tpu.memory_space<vmem>>, %arg4: memref<1x1x128xf32, #tpu.memory_space<vmem>>, %arg5: memref<1x128x128xf32, #tpu.memory_space<vmem>>, %arg6: memref<1x1x128xf32, #tpu.memory_space<vmem>>, %arg7: memref<1x8x128xf32, #tpu.memory_space<vmem>>) attributes {dimension_semantics = [#tpu.dimension_semantics<parallel>, #tpu.dimension_semantics<parallel>], iteration_bounds = array<i64: 2, 1>, scalar_prefetch = 0 : i64, scratch_operands = 0 : i64, tpu.core_type = #tpu.core_type<tc>, window_params = [{transform_indices = @transform_0, window_bounds = array<i64: 1, 8, 32>}, {transform_indices = @transform_1, window_bounds = array<i64: 1, 32, 128>}, {transform_indices = @transform_2, window_bounds = array<i64: 1, 1, 128>}, {transform_indices = @transform_3, window_bounds = array<i64: 1, 128, 128>}, {transform_indices = @transform_4, window_bounds = array<i64: 1, 1, 128>}, {transform_indices = @transform_5, window_bounds = array<i64: 1, 8, 128>}]} {
    %c0 = arith.constant 0 : index
    %c0_0 = arith.constant 0 : index
    %c0_1 = arith.constant 0 : index
    %0 = vector.load %arg2[%c0, %c0_0, %c0_1] : memref<1x8x32xf32, #tpu.memory_space<vmem>>, vector<1x8x32xf32>
    %1 = vector.shape_cast %0 : vector<1x8x32xf32> to vector<8x32xf32>
    %c0_2 = arith.constant 0 : index
    %c0_3 = arith.constant 0 : index
    %c0_4 = arith.constant 0 : index
    %2 = vector.load %arg3[%c0_2, %c0_3, %c0_4] : memref<1x32x128xf32, #tpu.memory_space<vmem>>, vector<1x32x128xf32>
    %3 = vector.shape_cast %2 : vector<1x32x128xf32> to vector<32x128xf32>
    %cst = arith.constant dense<0.000000e+00> : vector<8x128xf32>
    %4 = tpu.matmul %1, %3, %cst {dimension_numbers = #tpu.dot_dimension_numbers<[1], [0], [0], [1], [0, 0, 1, 1], [], []>} : vector<8x32xf32>, vector<32x128xf32>, vector<8x128xf32> -> vector<8x128xf32>
    %c0_5 = arith.constant 0 : index
    %c0_6 = arith.constant 0 : index
    %c0_7 = arith.constant 0 : index
    %5 = vector.load %arg4[%c0_5, %c0_6, %c0_7] : memref<1x1x128xf32, #tpu.memory_space<vmem>>, vector<1x1x128xf32>
    %6 = vector.shape_cast %5 : vector<1x1x128xf32> to vector<1x128xf32>
    %7 = vector.broadcast %6 : vector<1x128xf32> to vector<8x128xf32>
    %8 = arith.addf %4, %7 : vector<8x128xf32>
    %cst_8 = arith.constant 0.000000e+00 : f32
    %9 = vector.broadcast %cst_8 : f32 to vector<8x128xf32>
    %10 = arith.maximumf %8, %9 : vector<8x128xf32>
    %c0_9 = arith.constant 0 : index
    %c0_10 = arith.constant 0 : index
    %c0_11 = arith.constant 0 : index
    %11 = vector.load %arg5[%c0_9, %c0_10, %c0_11] : memref<1x128x128xf32, #tpu.memory_space<vmem>>, vector<1x128x128xf32>
    %12 = vector.shape_cast %11 : vector<1x128x128xf32> to vector<128x128xf32>
    %cst_12 = arith.constant dense<0.000000e+00> : vector<8x128xf32>
    %13 = tpu.matmul %10, %12, %cst_12 {dimension_numbers = #tpu.dot_dimension_numbers<[1], [0], [0], [1], [0, 0, 1, 1], [], []>} : vector<8x128xf32>, vector<128x128xf32>, vector<8x128xf32> -> vector<8x128xf32>
    %c0_13 = arith.constant 0 : index
    %c0_14 = arith.constant 0 : index
    %c0_15 = arith.constant 0 : index
    %14 = vector.load %arg6[%c0_13, %c0_14, %c0_15] : memref<1x1x128xf32, #tpu.memory_space<vmem>>, vector<1x1x128xf32>
    %15 = vector.shape_cast %14 : vector<1x1x128xf32> to vector<1x128xf32>
    %16 = vector.broadcast %15 : vector<1x128xf32> to vector<8x128xf32>
    %17 = arith.addf %13, %16 : vector<8x128xf32>
    %cst_16 = arith.constant 0.000000e+00 : f32
    %18 = vector.broadcast %cst_16 : f32 to vector<8x128xf32>
    %19 = arith.maximumf %17, %18 : vector<8x128xf32>
    %c0_17 = arith.constant 0 : index
    %c0_18 = arith.constant 0 : index
    %c0_19 = arith.constant 0 : index
    %20 = vector.load %arg7[%c0_17, %c0_18, %c0_19] : memref<1x8x128xf32, #tpu.memory_space<vmem>>, vector<1x8x128xf32>
    %21 = vector.shape_cast %20 : vector<1x8x128xf32> to vector<8x128xf32>
    %22 = vector.shape_cast %19 : vector<8x128xf32> to vector<1x8x128xf32>
    tpu.vector_store %arg7[%c0_17, %c0_18, %c0_19], %22 {strides = array<i32>} : memref<1x8x128xf32, #tpu.memory_space<vmem>>, vector<1x8x128xf32>,
    return
  }
  func.func @transform_0(%arg0: i32, %arg1: i32) -> (i32, i32, i32) {
    %c0_i32 = arith.constant 0 : i32
    %c0_i32_0 = arith.constant 0 : i32
    return %arg0, %arg1, %c0_i32 : i32, i32, i32
  }
  func.func @transform_1(%arg0: i32, %arg1: i32) -> (i32, i32, i32) {
    %c0_i32 = arith.constant 0 : i32
    %c0_i32_0 = arith.constant 0 : i32
    %c0_i32_1 = arith.constant 0 : i32
    return %arg0, %c0_i32, %c0_i32_0 : i32, i32, i32
  }
  func.func @transform_2(%arg0: i32, %arg1: i32) -> (i32, i32, i32) {
    %c0_i32 = arith.constant 0 : i32
    %c0_i32_0 = arith.constant 0 : i32
    %c0_i32_1 = arith.constant 0 : i32
    return %arg0, %c0_i32, %c0_i32_0 : i32, i32, i32
  }
  func.func @transform_3(%arg0: i32, %arg1: i32) -> (i32, i32, i32) {
    %c0_i32 = arith.constant 0 : i32
    %c0_i32_0 = arith.constant 0 : i32
    %c0_i32_1 = arith.constant 0 : i32
    return %arg0, %c0_i32, %c0_i32_0 : i32, i32, i32
  }
  func.func @transform_4(%arg0: i32, %arg1: i32) -> (i32, i32, i32) {
    %c0_i32 = arith.constant 0 : i32
    %c0_i32_0 = arith.constant 0 : i32
    %c0_i32_1 = arith.constant 0 : i32
    return %arg0, %c0_i32, %c0_i32_0 : i32, i32, i32
  }
  func.func @transform_5(%arg0: i32, %arg1: i32) -> (i32, i32, i32) {
    %c0_i32 = arith.constant 0 : i32
    %c0_i32_0 = arith.constant 0 : i32
    return %arg0, %arg1, %c0_i32 : i32, i32, i32
  }
}

</mosaic_0001>

<bundles_post_ra>
// kernel: tpu_custom_call.1
= control target key start
LH: loop header
LB: loop body
LE: loop exit
PB: predicated region body
PF: predicated region fallthrough
CT: control target
= control target key end

     0   :  { %s1193_s0 = inlined_call_operand.hbm [shape: f32[2,8,32], index: 0, kind: input, shape index: {}]   ;;  %s1194_s1 = inlined_call_operand.hbm [shape: f32[2,32,128], index: 1, kind: input, shape index: {}]   ;;  %s1195_s2 = inlined_call_operand.hbm [shape: f32[2,1,128], index: 2, kind: input, shape index: {}]   ;;  %s1196_s3 = inlined_call_operand.hbm [shape: f32[2,128,128], index: 3, kind: input, shape index: {}]   ;;  %s1197_s4 = inlined_call_operand.vmem [shape: f32[2,1,128], index: 4, kind: input, shape index: {}]   ;;  %s1198_s5 = inlined_call_operand.hbm [shape: f32[2,8,128], index: 5, kind: output, shape index: {}]  }
   0x1   :  { %1205 = sst [smem:[#allocation19_spill]] %s1194_s1 }
   0x2   :  { %10 = vsyncpa [#allocation3], 0 }
   0x3   :  { %12 = vsyncpa [#allocation3 + $0x1], 0 }
   0x4   :  { %13 = vsyncpa [#allocation6], 0 }
   0x5   :  { %15 = vsyncpa [#allocation6 + $0x1], 0 }
   0x6   :  { %16 = vsyncpa [#allocation9], 0 }
   0x7   :  { %18 = vsyncpa [#allocation9 + $0x1], 0 }
   0x8   :  { %19 = vsyncpa [#allocation4], 0 }
   0x9   :  { %21 = vsyncpa [#allocation4 + $0x1], 0  ;;  %s982_s18 = smov 0   ;;  %s984_s19 = smov 0  }
   0xa   :  { %s986_s20 = smov 0   ;;  %s988_s21 = smov 0  }
   0xb   :  { %s990_s22 = smov 0   ;;  %s992_s23 = smov 0  }
   0xc LB: > { %1206 = sst [smem:[#allocation15_spill]] %s936_s20  ;;  %s1013_s24 = sadd.s32 4294967295, %s948_s23   ;;  %s948_s23 = sphi %s992_s23, %s27_s23   ;;  %s944_s22 = sphi %s990_s22, %s1226_s22   ;;  %s940_s21 = sphi %s988_s21, %s1225_s21   ;;  %s936_s20 = sphi %s986_s20, %s1221_s20   ;;  %s932_s19 = sphi %s984_s19, %s1224_s19   ;;  %s928_s18 = sphi %s982_s18, %s1223_s18  }
   0xd   : > { %1207 = sst [smem:[#allocation16_spill]] %s948_s23  ;;  %s634_s25 = sadd.s32 4294967294, %s948_s23  }
   0xe   : > { %s39_s26 = sadd.s32 1, %s944_s22  ;;  %s48_s27 = sadd.s32 1, %s936_s20 }
   0xf   : > { %p41_p0 = scmp.ge.s32.totalorder %s39_s26, 2  ;;  %p55_p1 = scmp.ne.s32.totalorder %s936_s20, %s932_s19 }
  0x10   : > { %p56_p2 = scmp.eq.s32.totalorder %s948_s23, 0  ;;  %p61_p3 = scmp.ne.s32.totalorder %s932_s19, %s928_s18 }
  0x11   : > { %s1228_s26 = smov (%p41_p0, %s39_s26), 0  ;;  %p62_p5 = scmp.eq.s32.totalorder %s1013_s24, 0 }
  0x12   : > { %1208 = sst [smem:[#allocation17_spill]] %s1228_s26  ;;  %p1025_p4 = por %p56_p2, %p55_p1 }
  0x13   : > { %s43_s29 = ssub.s32 %s944_s22, %s1228_s26  ;;  %p191_p6 = scmp.eq.s32.totalorder %s1013_s24, 1 }
  0x14   : > { %p46_p7 = scmp.eq.s32.totalorder %s43_s29, 0  ;;  %p1033_p8 = por %p62_p5, %p61_p3 }
  0x15   : > { %p1037_p9 = por %p191_p6, %p55_p1  ;;  %p197_p10 = scmp.eq.s32.totalorder %s634_s25, 1 }
  0x16   : > { %s1042_s7 = scalar_select %p46_p7, %s936_s20, %s48_s27  }
  0x17   : > { %p1044_p11 = por %p197_p10, %p61_p3  ;;  %p636_p12 = scmp.ge.s32.totalorder %s948_s23, 2 }
  0x18   : > { %1212 = sst [smem:[#allocation18_spill]] %s1042_s7  ;;  %p684_p13 = scmp.lt.s32.totalorder %s948_s23, 2 }
  0x19   : > { %s1051_s9 = sand.u32 1, %s936_s20   ;;  %s237_s10 = sand.u32 1, %s948_s23  }
  0x1a   : > { %s639_s11 = sshll.u32 %s1051_s9, 5  ;;  %p1057_p0 = pnand %p684_p13, %p1025_p4 }
  0x1b   : > { %s655_s13 = sshll.u32 %s944_s22, 5  ;;  %s1215_s1 = sld [smem:[#allocation19_spill]] }
  0x1c   : > { %s241_s25 = scalar_lea.vmem [#allocation5], %s639_s11  ;;  %s238_s29 = scalar_lea.sflag [#allocation6], %s237_s10 }
  0x1d   : > { %s249_s27 = sshll.u32 %s241_s25, 4  ;;  %s1200_s28 = smov 128   ;;  %s250_s27 = int_to_ptr.vmem [resolvable:$true] %s249_s27 }
  0x1e   : > { %s1201_s26 = smov 8   ;;  %p645_p1 = scmp.ge.s32.totalorder %s948_s23, 1 }
  0x1f   : > { %p302_p2 = scmp.lt.s32.totalorder %s948_s23, 3  ;;  %s637_s11 = sshll.u32 %s1051_s9, 3 }
  0x20   : > { %s638_s14 = sshll.u32 %s944_s22, 3  ;;  %s262_s23 = scalar_lea.vmem [#allocation7], %s1051_s9 }
  0x21   : > { %s246_s16 = scalar_lea.hbm %s1215_s1, %s655_s13  ;;  %p1072_p3 = pnand %p645_p1, %p302_p2 }
  0x22   : > { %s247_s17 = sshll.u32 %s246_s16, 4  ;;  %s226_s16 = scalar_lea.hbm %s1193_s0, %s638_s14  ;;  %s248_s17 = int_to_ptr.hbm [resolvable:$true] %s247_s17 }
  0x23   : > { %673 = dma.hbm_to_vmem [thread:$0]  (!%p1057_p0), %s248_s17, 512, %s250_s27, %s238_s29, %s1200_s28, %s1200_s28, %s1201_s26  }
  0x24   : > { %s228_s25 = sshll.u32 %s226_s16, 4  ;;  %s221_s1 = scalar_lea.vmem [#allocation2], %s637_s11  ;;  %s229_s25 = int_to_ptr.hbm [resolvable:$true] %s228_s25 }
  0x25   : > { %s230_s7 = sshll.u32 %s221_s1, 4  ;;  %s218_s17 = scalar_lea.sflag [#allocation3], %s1051_s9  ;;  %s231_s7 = int_to_ptr.vmem [resolvable:$true] %s230_s7 }
  0x26   : > { %670 = dma.hbm_to_vmem [thread:$0]  (!%p1057_p0), %s229_s25, 128, %s231_s7, %s218_s17  }
  0x27   : > { %s265_s26 = scalar_lea.hbm %s1195_s2, %s944_s22  ;;  %s269_s10 = sshll.u32 %s262_s23, 4  ;;  %s270_s10 = int_to_ptr.vmem [resolvable:$true] %s269_s10 }
  0x28   : > { %s267_s20 = sshll.u32 %s265_s26, 4  ;;  %s642_s11 = sshll.u32 %s1051_s9, 7  ;;  %s268_s20 = int_to_ptr.hbm [resolvable:$true] %s267_s20 }
  0x29   : > { %676 = dma.hbm_to_vmem [thread:$0]  (!%p1057_p0), %s268_s20, 16, %s270_s10, %s238_s29  }
  0x2a   : > { %s656_s1 = sshll.u32 %s944_s22, 7  ;;  %s280_s7 = scalar_lea.vmem [#allocation8], %s642_s11 }
  0x2b   : > { %s285_s16 = scalar_lea.hbm %s1196_s3, %s656_s1  ;;  %s288_s25 = sshll.u32 %s280_s7, 4  ;;  %s289_s25 = int_to_ptr.vmem [resolvable:$true] %s288_s25 }
  0x2c   : > { %s286_s17 = sshll.u32 %s285_s16, 4  ;;  %s277_s28 = scalar_lea.sflag [#allocation9], %s1051_s9  ;;  %s287_s17 = int_to_ptr.hbm [resolvable:$true] %s286_s17 }
  0x2d   : > { %s1217_s26 = smov 8   ;;  %s1218_s27 = smov 128  }
  0x2e   : > { %679 = dma.hbm_to_vmem [thread:$0]  (!%p1057_p0), %s287_s17, 2048, %s289_s25, %s277_s28, %s1218_s27, %s1218_s27, %s1217_s26  }
  0x2f   : > { %306 = sbr.rel (%p1072_p3) target bundleno = 330 (0x14a), region = 40  ;;  %s1105_s20 = sand.u32 (!%p1072_p3), 1, %s932_s19  }
  0x30   : > { %s646_s23 = sshll.u32 (!%p1072_p3), %s1105_s20, 3  ;;  %s309_s29 = scalar_lea.sflag (!%p1072_p3), [#allocation3], %s1105_s20 }
  0x31   : > { %s312_s10 = scalar_lea.vmem (!%p1072_p3), [#allocation2], %s646_s23 }
  0x34   : > { %911 = dma.done.wait (%p1033_p8), %s309_s29, 128  }
  0x35   : > { %913 = vsyncadd (%p1033_p8), %s309_s29, 4294967168  ;;  %s318_s9 = sand.u32 1, %s1013_s24   ;;  %s647_s12 = sshll.u32 %s1105_s20, 5 }
  0x36   : > { %s319_s13 = scalar_lea.sflag [#allocation6], %s318_s9  ;;  %s322_s11 = scalar_lea.vmem [#allocation5], %s647_s12 }
  0x37   : > { %915 = dma.done.wait (%p1033_p8), %s319_s13, 528  }
  0x38   : > { %917 = vsyncadd (%p1033_p8), %s319_s13, 4294966768  ;;  %s648_s1 = sshll.u32 %s1105_s20, 7  ;;  %s331_s14 = scalar_lea.vmem [#allocation7], %s1105_s20 }
  0x39   : > { %s338_s15 = scalar_lea.sflag [#allocation9], %s1105_s20  ;;  %s1124_s16 = scalar_lea.vmem [#allocation8], %s648_s1 }
  0x3a   : > { %919 = dma.done.wait (%p1033_p8), %s338_s15, 2048  }
  0x3b   : > { %921 = vsyncadd (%p1033_p8), %s338_s15, 4294965248  ;;  %v393_v0 = vld [vmem:[%s322_s11 + $0x18] sm:$0xff]  ;;  %v392_v1 = vld [vmem:[%s322_s11 + $0x10] sm:$0xff]  ;;  %vm398_vm0 = vcmask 261120   ;;  %p386_p4 = scmp.lt.s32.totalorder %s940_s21, 1  ;;  %s652_s17 = sshll.u32 %s940_s21, 3 }
  0x3c   : > { %414 = vmatpush.msra.mxu0 %v393_v0  ;;  %v438_v2 = vld [vmem:[%s1124_s16 + $0x78] sm:$0xff]  ;;  %v391_v3 = vld [vmem:[%s322_s11 + $0x8] sm:$0xff]  ;;  %v437_v4 = vld [vmem:[%s1124_s16 + $0x70] sm:$0xff]  ;;  %s477_s27 = scalar_lea.hbm %s1198_s5, %s652_s17  ;;  %s385_s29 = scalar_lea.vmem [#allocation10], %s646_s23 }
  0x3d   : > { %443 = vmatpush.msra.mxu1 %v438_v2  ;;  %v436_v5 = vld [vmem:[%s1124_s16 + $0x68] sm:$0xff]  ;;  %v390_v6 = vld [vmem:[%s322_s11] sm:$0xff]  ;;  %v433_v10 = vld [vmem:[%s1124_s16 + $0x50] sm:$0xff]  ;;  %s387_s24 = scalar_select %p386_p4, %s940_s21, 1 }
  0x3e   : > { %415 = vmatpush.msra.mxu0 %v392_v1  ;;  %v389_v7 = vld [vmem:[%s312_s10] sm:$0xff]  ;;  %v435_v8 = vld [vmem:[%s1124_s16 + $0x60] sm:$0xff]  ;;  %s479_s10 = sshll.u32 %s385_s29, 4  ;;  %s481_s9 = sshll.u32 %s477_s27, 4  ;;  %s480_s10 = int_to_ptr.vmem [resolvable:$true] %s479_s10  ;;  %s482_s9 = int_to_ptr.hbm [resolvable:$true] %s481_s9 }
  0x3f   : > { %444 = vmatpush.msra.mxu1 %v437_v4  ;;  %v434_v9 = vld [vmem:[%s1124_s16 + $0x58] sm:$0xff]  ;;  %v432_v11 = vld [vmem:[%s1124_s16 + $0x48] sm:$0xff]  ;;  %v431_v12 = vld [vmem:[%s1124_s16 + $0x40] sm:$0xff]  ;;  %s388_s25 = scalar_lea.vmem %s1197_s4, %s387_s24  ;;  %s466_s12 = scalar_lea.sflag [#allocation4], %s1105_s20 }
  0x40   : > { %416 = vmatpush.msra.mxu0 %v391_v3  ;;  %v430_v13 = vld [vmem:[%s1124_s16 + $0x38] sm:$0xff]  ;;  %v429_v14 = vld [vmem:[%s1124_s16 + $0x30] sm:$0xff]  ;;  %v428_v15 = vld [vmem:[%s1124_s16 + $0x28] sm:$0xff]  ;;  %s872_s13 = sshra.s32 %s482_s9, 4  ;;  %s873_s13 = int_to_ptr.hbm [resolvable:$true] %s872_s13 }
  0x41   : > { %445 = vmatpush.msra.mxu1 %v436_v5  ;;  %v427_v16 = vld [vmem:[%s1124_s16 + $0x20] sm:$0xff]  ;;  %v426_v17 = vld [vmem:[%s1124_s16 + $0x18] sm:$0xff]  ;;  %v425_v18 = vld [vmem:[%s1124_s16 + $0x10] sm:$0xff]  ;;  %s874_s21 = scalar_lea.hbm %s873_s13, 8  ;;  %p879_p8 = scmp.lt.s32.totalorder %s873_s13, %s1198_s5 }
  0x42   : > { %417 = vmatpush.msra.mxu0 %v390_v6  ;;  %v424_v19 = vld [vmem:[%s1124_s16 + $0x8] sm:$0xff]  ;;  %v423_v20 = vld [vmem:[%s1124_s16] sm:$0xff]  ;;  %p875_p5 = scmp.ne.s32.totalorder %s873_s13, %s874_s21 }
  0x43   : > { %650 = vmatmul.msk.f32.vlgmr.msra.gmra.mxu0 %vm398_vm0, %v389_v7  ;;  %446 = vmatpush.msra.mxu1 %v435_v8  ;;  %v736_v21 = vld [vmem:[%s331_s14] ss:$0 sm:$0xff]  ;;  %s878_s14 = scalar_lea.hbm %s1198_s5, 16 }
  0x44   : > { %v737_v25 = vld [vmem:[%s388_s25] ss:$0 sm:$0xff]  ;;  %p876_p6 = pnand %p875_p5, %p1037_p9  ;;  %p880_p10 = scmp.lt.s32.totalorder %s878_s14, %s874_s21 }
  0x45   : > { %447 = vmatpush.msra.mxu1 %v434_v9 }
  0x46   : > { %p877_p7 = pneg %p876_p6  ;;  %p881_p13 = por %p880_p10, %p879_p8 }
  0x47   : > { %448 = vmatpush.msra.mxu1 %v433_v10 }
  0x48   : > { %p882_p0 = pnand %p881_p13, %p877_p7 }
  0x49   : > { %449 = vmatpush.msra.mxu1 %v432_v11 }
  0x4b   : > { %450 = vmatpush.msra.mxu1 %v431_v12 }
  0x4d   : > { %451 = vmatpush.msra.mxu1 %v430_v13 }
  0x4f   : > { %452 = vmatpush.msra.mxu1 %v429_v14 }
  0x51   : > { %453 = vmatpush.msra.mxu1 %v428_v15 }
  0x53   : > { %454 = vmatpush.msra.mxu1 %v427_v16 }
  0x55   : > { %455 = vmatpush.msra.mxu1 %v426_v17 }
  0x57   : > { %456 = vmatpush.msra.mxu1 %v425_v18 }
  0x59   : > { %457 = vmatpush.msra.mxu1 %v424_v19 }
  0x5b   : > { %458 = vmatpush.msra.mxu1 %v423_v20 }
  0xc0   : > { %v419_v22 = vpop.f32.mrf.mxu0 }
  0xc1   : > { %v420_v23 = vadd.f32 %v736_v21, %v419_v22 }
  0xc3   : > { %v422_v24 = vmax.f32 %v420_v23, 0.0 }
  0xc5   : > { %459 = vmatmul.f32.vlgmr.msra.gmra.mxu1 %v422_v24 }
 0x142   : > { %v460_v26 = vpop.f32.mrf.mxu1 }
 0x143   : > { %v461_v27 = vadd.f32 %v737_v25, %v460_v26 }
 0x145   : > { %v463_v28 = vmax.f32 %v461_v27, 0.0 }
 0x147   : > { %464 = vst [vmem:[%s385_s29] sm:$0xff] %v463_v28 }
 0x148   : > { %885 = shalt.err (!%p882_p0)
}
 0x149   : > { %665 = dma.vmem_to_hbm [thread:$0]  (%p1037_p9), %s480_s10, 128, %s482_s9, %s466_s12  }
 0x14a PF: > { %s1219_s20 = sld [smem:[#allocation16_spill]]  ;;  %s493_s16 = sand.u32 1, %s928_s18  }
 0x14b   : > { %p681_p1 = pnand %p636_p12, %p1044_p11  ;;  %s494_s24 = scalar_lea.sflag [#allocation4], %s493_s16 }
 0x14d   : > { %p682_p2 = pneg %p681_p1 }
 0x14f   : > { %923 = dma.done.wait (%p682_p2), %s494_s24, 128  }
 0x150   : > { %925 = vsyncadd (%p682_p2), %s494_s24, 4294967168  ;;  %s27_s23 = sadd.s32 1, %s1219_s20   ;;  %s1220_s30 = sld [smem:[#allocation15_spill]] }
 0x151   : > { %p24_p3 = scmp.ge.s32.totalorder %s27_s23, 4   ;;  %s1221_s20 = sld [smem:[#allocation18_spill]] }
 0x152   : > { %s1222_s6 = sld [smem:[#allocation17_spill]]  ;;  %s1223_s18 = smov %s932_s19 }
 0x153   : > { %s1225_s21 = smov %s944_s22 }
 0x154   :  { %26 = sbr.rel (!%p24_p3) target bundleno = 12 (0xc), region = 125 }
 0x156   : > { %s1224_s19 = smov %s1220_s30 }
 0x158   : > { %s1226_s22 = smov %s1222_s6 }
 0x159   :  { %500 = vsyncpa [#allocation3], 1 }
 0x15a   :  { %502 = vsyncpa [#allocation3 + $0x1], 1 }
 0x15b   :  { %503 = vsyncpa [#allocation6], 1 }
 0x15c   :  { %505 = vsyncpa [#allocation6 + $0x1], 1 }
 0x15d   :  { %506 = vsyncpa [#allocation9], 1 }
 0x15e   :  { %508 = vsyncpa [#allocation9 + $0x1], 1 }
 0x15f   :  { %509 = vsyncpa [#allocation4], 1 }
 0x160   :  { %511 = vsyncpa [#allocation4 + $0x1], 1 }

</bundles_post_ra>
